<compile_context>
chip_gen: v6e
topology: v6e:2x2x1
jax: 0.10.0
libtpu: 0.0.40
codegen_flags: <defaults>
</compile_context>

<pallas_src>
import functools

import jax
import jax.numpy as jnp
from jax import lax
from jax.experimental import pallas as pl
from jax.experimental.pallas import tpu as pltpu

GAMMA = 1.5
ALPHA = 0.25
LANE = 128


def _cdiv(a, b):
    return -(-a // b)


def _round_up(a, b):
    return _cdiv(a, b) * b


def _focal_elementwise(x, y, gamma, alpha):
    """Per-element focal BCE-with-logits (pure JAX). Used for the <128-element
    flat tail and as the correctness reference."""
    x = x.astype(jnp.float32)
    y = y.astype(jnp.float32)
    bce = jnp.maximum(x, 0.0) - x * y + jnp.log1p(jnp.exp(-jnp.abs(x)))
    p = jax.nn.sigmoid(x)
    p_t = y * p + (1.0 - y) * (1.0 - p)
    af = y * alpha + (1.0 - y) * (1.0 - alpha)
    mf = (1.0 - p_t) ** gamma
    return bce * af * mf


def _focal_loss_kernel(pred_ref, true_ref, out_ref, acc_ref, *, gamma, alpha,
                       fold, block_rows, steps, rows_valid):
    """One grid step: elementwise focal BCE-with-logits folded into an (8,128)
    per-split accumulator.  The boundary (or fully-overhanging) block is masked
    against `rows_valid`; interior blocks skip the mask entirely."""
    c = pl.program_id(0)   # parallel split (megacore on v7x)
    i = pl.program_id(1)   # reduction axis (last in grid)

    @pl.when(i == 0)
    def _():
        acc_ref[...] = jnp.zeros_like(acc_ref)

    x = pred_ref[...].astype(jnp.float32)   # logits
    y = true_ref[...].astype(jnp.float32)   # targets in [0, 1]

    # One exp per element, reused by both the BCE log-term and the sigmoid.
    t = jnp.exp(-jnp.abs(x))                                  # e^{-|x|} in (0,1]

    # Numerically stable BCE-with-logits (matches torch.nn.BCEWithLogitsLoss):
    #   loss = max(x, 0) - x*y + log(1 + e^{-|x|})
    bce = jnp.maximum(x, 0.0) - x * y + jnp.log1p(t)

    # sigmoid(x) = where(x>=0, 1, t) / (1 + t)   (reuses t; approx EUP recip).
    p = jnp.where(x >= 0.0, 1.0, t) * pl.reciprocal(1.0 + t, approx=True)

    # alpha_factor = y*a + (1-y)*(1-a) = (1-a) + y*(2a-1)   (a is a Python const)
    alpha_factor = (1.0 - alpha) + y * (2.0 * alpha - 1.0)
    # m = 1 - p_t = y + p*(1 - 2y); clamp >= 0 (approx recip can push p > 1).
    m = jnp.maximum(y + p * (1.0 - 2.0 * y), 0.0)
    if gamma == 1.5:
        modulating = m * jnp.sqrt(m)          # m**1.5 without pow (log+exp)
    elif gamma == 2.0:
        modulating = m * m
    else:
        modulating = m ** gamma
    loss = bce * alpha_factor * modulating

    # Fold (block_rows, 128) -> (8, 128): pure VPU vreg adds, no XLU per step.
    def fold_sum(v):
        return v.reshape(fold, 8, LANE).sum(axis=0)

    row0 = (c * steps + i) * block_rows       # logical (unclamped) row offset

    @pl.when(row0 + block_rows <= rows_valid)   # fully in-bounds: no mask
    def _():
        acc_ref[...] += fold_sum(loss)

    @pl.when(row0 + block_rows > rows_valid)    # boundary / overhang: mask rows
    def _():
        rid = row0 + lax.broadcasted_iota(jnp.int32, (block_rows, LANE), 0)
        acc_ref[...] += fold_sum(jnp.where(rid < rows_valid, loss, 0.0))

    @pl.when(i == pl.num_programs(1) - 1)
    def _():
        out_ref[...] = acc_ref[...]


def _num_tensorcores():
    """Best-effort TensorCore count (2 on v7x, 1 on v5e/v6e); safe fallback 1."""
    try:
        info = pltpu.get_tpu_info()
        for attr in ("num_tensorcores", "tensorcores_per_chip", "num_cores",
                     "cores_per_chip", "core_count"):
            n = getattr(info, attr, None)
            if isinstance(n, int) and n >= 1:
                return n
    except Exception:
        pass
    return 1


def focal_loss(pred, true, *, gamma=GAMMA, alpha=ALPHA, block_rows=4096,
               num_splits=None):
    """pred, true: same shape (e.g. NCHW logits / targets). Returns scalar mean loss.

    Inputs may be f32 or bf16 (the kernel upcasts in-VMEM; no wrapper-side cast).
    """
    # TODO(synk): only the module's default 'mean' reduction path is implemented
    # ('sum'/'none' of the wrapped loss_fcn are not).
    assert pred.shape == true.shape
    total = pred.size

    pred_flat = pred.reshape(-1)
    true_flat = true.reshape(-1)

    rows = total // LANE            # full lane-dense rows
    tail = total - rows * LANE      # < 128 leftover elements

    # Tail handled with a tiny pure-JAX sum (no padding copy of the big slab).
    if tail:
        tail_sum = jnp.sum(_focal_elementwise(pred_flat[rows * LANE:],
                                              true_flat[rows * LANE:],
                                              gamma, alpha))
    else:
        tail_sum = jnp.float32(0.0)

    if rows == 0:                    # tiny input: everything was the tail
        return tail_sum / jnp.float32(total)

    # Main slab: zero-copy view when total % 128 == 0 (slice is the identity).
    pred2d = pred_flat[:rows * LANE].reshape(rows, LANE)
    true2d = true_flat[:rows * LANE].reshape(rows, LANE)

    # Tile sizing: multiple of 16 rows (f32 and bf16 friendly), capped to slab.
    block_rows_eff = max(16, min(_round_up(block_rows, 16), _round_up(rows, 16)))
    nblocks = _cdiv(rows, block_rows_eff)

    if num_splits is None:
        num_splits = 2 if _num_tensorcores() >= 2 else 1
    num_splits = max(1, min(num_splits, nblocks))
    steps = _cdiv(nblocks, num_splits)

    kernel = functools.partial(
        _focal_loss_kernel, gamma=gamma, alpha=alpha,
        fold=block_rows_eff // 8, block_rows=block_rows_eff, steps=steps,
        rows_valid=rows)

    def in_map(c, i):
        # Clamp so fully-out-of-range steps (only possible when num_splits does
        # not divide nblocks) re-read the last valid block; the in-kernel row
        # mask zeroes their contribution.
        return (jnp.minimum(c * steps + i, nblocks - 1), 0)

    partials = pl.pallas_call(
        kernel,
        out_shape=jax.ShapeDtypeStruct((num_splits * 8, LANE), jnp.float32),
        grid_spec=pltpu.PrefetchScalarGridSpec(
            num_scalar_prefetch=0,
            grid=(num_splits, steps),
            in_specs=[
                pl.BlockSpec((block_rows_eff, LANE), in_map),
                pl.BlockSpec((block_rows_eff, LANE), in_map),
            ],
            out_specs=pl.BlockSpec((8, LANE), lambda c, i: (c, 0)),
            scratch_shapes=[pltpu.VMEM((8, LANE), jnp.float32)],
        ),
        compiler_params=pltpu.CompilerParams(
            dimension_semantics=("parallel", "arbitrary")),
    )(pred2d, true2d)

    # Single tiny cross-lane reduction + mean normalization, outside the kernel.
    return (jnp.sum(partials) + tail_sum) / jnp.float32(total)


def _focal_loss_ref(pred, true, gamma=GAMMA, alpha=ALPHA):
    """Pure-JAX reference mirroring the PyTorch FocalLoss(BCEWithLogitsLoss())."""
    return jnp.mean(_focal_elementwise(pred, true, gamma, alpha))


if __name__ == "__main__":
    key = jax.random.PRNGKey(0)
    k1, k2, k3, k4, k5, k6 = jax.random.split(key, 6)

    # NCHW logits and binary targets (as in YOLO obj/cls losses): 2048 elements,
    # a multiple of 128 -> fully zero-copy path.
    B, C, H, W = 2, 4, 16, 16
    pred = jax.random.normal(k1, (B, C, H, W), dtype=jnp.float32) * 2.0
    true = (jax.random.uniform(k2, (B, C, H, W)) > 0.7).astype(jnp.float32)
    out = jax.block_until_ready(focal_loss(pred, true))
    ref = _focal_loss_ref(pred, true)
    assert jnp.allclose(out, ref, rtol=2e-3, atol=1e-5), (out, ref)

    # Odd shape (1155 elements): exercises the in-kernel boundary mask and the
    # <128-element pure-JAX tail.
    pred2 = jax.random.normal(k3, (3, 5, 7, 11), dtype=jnp.float32) * 2.0
    true2 = (jax.random.uniform(k4, (3, 5, 7, 11)) > 0.5).astype(jnp.float32)
    out2 = jax.block_until_ready(focal_loss(pred2, true2))
    ref2 = _focal_loss_ref(pred2, true2)
    assert jnp.allclose(out2, ref2, rtol=2e-3, atol=1e-5), (out2, ref2)

    # Multi-block + 2-way split with a non-dividing block count: exercises the
    # reduction loop, the clamped index_map and the masked overhang block.
    pred3 = jax.random.normal(k5, (2, 4, 32, 20), dtype=jnp.float32) * 2.0
    true3 = (jax.random.uniform(k6, (2, 4, 32, 20)) > 0.6).astype(jnp.float32)
    out3 = jax.block_until_ready(
        focal_loss(pred3, true3, block_rows=16, num_splits=2))
    ref3 = _focal_loss_ref(pred3, true3)
    assert jnp.allclose(out3, ref3, rtol=2e-3, atol=1e-5), (out3, ref3)

    print("KERNEL_OK")
</pallas_src>

<mosaic_0001>
module attributes {stable_mosaic.version = 11 : i64} {
  func.func @_focal_loss_kernel(%arg0: i32, %arg1: i32, %arg2: memref<16x128xf32, #tpu.memory_space<vmem>>, %arg3: memref<16x128xf32, #tpu.memory_space<vmem>>, %arg4: memref<8x128xf32, #tpu.memory_space<vmem>>, %arg5: memref<8x128xf32, #tpu.memory_space<vmem>>) attributes {dimension_semantics = [#tpu.dimension_semantics<parallel>, #tpu.dimension_semantics<arbitrary>], iteration_bounds = array<i64: 1, 1>, scalar_prefetch = 0 : i64, scratch_operands = 1 : i64, tpu.core_type = #tpu.core_type<tc>, window_params = [{transform_indices = @transform_0, window_bounds = array<i64: 16, 128>}, {transform_indices = @transform_1, window_bounds = array<i64: 16, 128>}, {transform_indices = @transform_2, window_bounds = array<i64: 8, 128>}]} {
    %c0_i32 = arith.constant 0 : i32
    %0 = arith.cmpi eq, %arg1, %c0_i32 : i32
    %1 = arith.extui %0 : i1 to i32
    %c0_i32_0 = arith.constant 0 : i32
    %2 = arith.cmpi ne, %1, %c0_i32_0 : i32
    scf.if %2 {
      %cst_21 = arith.constant 0.000000e+00 : f32
      %53 = vector.broadcast %cst_21 : f32 to vector<8x128xf32>
      %c0_22 = arith.constant 0 : index
      %c0_23 = arith.constant 0 : index
      %54 = vector.load %arg5[%c0_22, %c0_23] : memref<8x128xf32, #tpu.memory_space<vmem>>, vector<8x128xf32>
      tpu.vector_store %arg5[%c0_22, %c0_23], %53 {strides = array<i32>} : memref<8x128xf32, #tpu.memory_space<vmem>>, vector<8x128xf32>,
    } else {
    }
    %c0 = arith.constant 0 : index
    %c0_1 = arith.constant 0 : index
    %3 = vector.load %arg2[%c0, %c0_1] : memref<16x128xf32, #tpu.memory_space<vmem>>, vector<16x128xf32>
    %c0_2 = arith.constant 0 : index
    %c0_3 = arith.constant 0 : index
    %4 = vector.load %arg3[%c0_2, %c0_3] : memref<16x128xf32, #tpu.memory_space<vmem>>, vector<16x128xf32>
    %5 = math.absf %3 : vector<16x128xf32>
    %cst = arith.constant 0.000000e+00 : f32
    %6 = vector.broadcast %cst : f32 to vector<16x128xf32>
    %7 = arith.subf %6, %5 : vector<16x128xf32>
    %8 = math.exp %7 : vector<16x128xf32>
    %cst_4 = arith.constant 0.000000e+00 : f32
    %9 = vector.broadcast %cst_4 : f32 to vector<16x128xf32>
    %10 = arith.maximumf %3, %9 : vector<16x128xf32>
    %11 = arith.mulf %3, %4 : vector<16x128xf32>
    %12 = arith.subf %10, %11 : vector<16x128xf32>
    %13 = math.log1p %8 : vector<16x128xf32>
    %14 = arith.addf %12, %13 : vector<16x128xf32>
    %cst_5 = arith.constant 0.000000e+00 : f32
    %15 = vector.broadcast %cst_5 : f32 to vector<16x128xf32>
    %16 = arith.cmpf oge, %3, %15 : vector<16x128xf32>
    %cst_6 = arith.constant 1.000000e+00 : f32
    %17 = vector.broadcast %cst_6 : f32 to vector<16x128xf32>
    %18 = arith.select %16, %17, %8 : vector<16x128xi1>, vector<16x128xf32>
    %cst_7 = arith.constant 1.000000e+00 : f32
    %19 = vector.broadcast %cst_7 : f32 to vector<16x128xf32>
    %20 = arith.addf %19, %8 : vector<16x128xf32>
    %21 = tpu.reciprocal %20 {approx = true} : vector<16x128xf32> -> vector<16x128xf32>
    %22 = arith.mulf %18, %21 : vector<16x128xf32>
    %cst_8 = arith.constant -5.000000e-01 : f32
    %23 = vector.broadcast %cst_8 : f32 to vector<16x128xf32>
    %24 = arith.mulf %4, %23 : vector<16x128xf32>
    %cst_9 = arith.constant 7.500000e-01 : f32
    %25 = vector.broadcast %cst_9 : f32 to vector<16x128xf32>
    %26 = arith.addf %25, %24 : vector<16x128xf32>
    %cst_10 = arith.constant 2.000000e+00 : f32
    %27 = vector.broadcast %cst_10 : f32 to vector<16x128xf32>
    %28 = arith.mulf %27, %4 : vector<16x128xf32>
    %cst_11 = arith.constant 1.000000e+00 : f32
    %29 = vector.broadcast %cst_11 : f32 to vector<16x128xf32>
    %30 = arith.subf %29, %28 : vector<16x128xf32>
    %31 = arith.mulf %22, %30 : vector<16x128xf32>
    %32 = arith.addf %4, %31 : vector<16x128xf32>
    %cst_12 = arith.constant 0.000000e+00 : f32
    %33 = vector.broadcast %cst_12 : f32 to vector<16x128xf32>
    %34 = arith.maximumf %32, %33 : vector<16x128xf32>
    %35 = math.sqrt %34 : vector<16x128xf32>
    %36 = arith.mulf %34, %35 : vector<16x128xf32>
    %37 = arith.mulf %14, %26 : vector<16x128xf32>
    %38 = arith.mulf %37, %36 : vector<16x128xf32>
    %c1_i32 = arith.constant 1 : i32
    %39 = arith.muli %arg0, %c1_i32 : i32
    %40 = arith.addi %39, %arg1 : i32
    %c16_i32 = arith.constant 16 : i32
    %41 = arith.muli %40, %c16_i32 : i32
    %c16_i32_13 = arith.constant 16 : i32
    %42 = arith.addi %41, %c16_i32_13 : i32
    %c16_i32_14 = arith.constant 16 : i32
    %43 = arith.cmpi sle, %42, %c16_i32_14 : i32
    %44 = arith.extui %43 : i1 to i32
    %c0_i32_15 = arith.constant 0 : i32
    %45 = arith.cmpi ne, %44, %c0_i32_15 : i32
    scf.if %45 {
      %c0_21 = arith.constant 0 : index
      %c0_22 = arith.constant 0 : index
      %53 = vector.load %arg5[%c0_21, %c0_22] : memref<8x128xf32, #tpu.memory_space<vmem>>, vector<8x128xf32>
      %54 = vector.shape_cast %38 : vector<16x128xf32> to vector<2x8x128xf32>
      %cst_23 = arith.constant dense<0.000000e+00> : vector<8x128xf32>
      %55 = vector.multi_reduction <add>, %54, %cst_23 [0] : vector<2x8x128xf32> to vector<8x128xf32>
      %56 = arith.addf %53, %55 : vector<8x128xf32>
      %c0_24 = arith.constant 0 : index
      %c0_25 = arith.constant 0 : index
      %57 = vector.load %arg5[%c0_24, %c0_25] : memref<8x128xf32, #tpu.memory_space<vmem>>, vector<8x128xf32>
      tpu.vector_store %arg5[%c0_24, %c0_25], %56 {strides = array<i32>} : memref<8x128xf32, #tpu.memory_space<vmem>>, vector<8x128xf32>,
    } else {
    }
    %c16_i32_16 = arith.constant 16 : i32
    %46 = arith.addi %41, %c16_i32_16 : i32
    %c16_i32_17 = arith.constant 16 : i32
    %47 = arith.cmpi sgt, %46, %c16_i32_17 : i32
    %48 = arith.extui %47 : i1 to i32
    %c0_i32_18 = arith.constant 0 : i32
    %49 = arith.cmpi ne, %48, %c0_i32_18 : i32
    scf.if %49 {
      %53 = tpu.iota {dimensions = array<i32: 0>} : vector<16x128xi32>
      %54 = vector.broadcast %41 : i32 to vector<16x128xi32>
      %55 = arith.addi %54, %53 : vector<16x128xi32>
      %c0_21 = arith.constant 0 : index
      %c0_22 = arith.constant 0 : index
      %56 = vector.load %arg5[%c0_21, %c0_22] : memref<8x128xf32, #tpu.memory_space<vmem>>, vector<8x128xf32>
      %c16_i32_23 = arith.constant 16 : i32
      %57 = vector.broadcast %c16_i32_23 : i32 to vector<16x128xi32>
      %58 = arith.cmpi slt, %55, %57 : vector<16x128xi32>
      %cst_24 = arith.constant 0.000000e+00 : f32
      %59 = vector.broadcast %cst_24 : f32 to vector<16x128xf32>
      %60 = arith.select %58, %38, %59 : vector<16x128xi1>, vector<16x128xf32>
      %61 = vector.shape_cast %60 : vector<16x128xf32> to vector<2x8x128xf32>
      %cst_25 = arith.constant dense<0.000000e+00> : vector<8x128xf32>
      %62 = vector.multi_reduction <add>, %61, %cst_25 [0] : vector<2x8x128xf32> to vector<8x128xf32>
      %63 = arith.addf %56, %62 : vector<8x128xf32>
      %c0_26 = arith.constant 0 : index
      %c0_27 = arith.constant 0 : index
      %64 = vector.load %arg5[%c0_26, %c0_27] : memref<8x128xf32, #tpu.memory_space<vmem>>, vector<8x128xf32>
      tpu.vector_store %arg5[%c0_26, %c0_27], %63 {strides = array<i32>} : memref<8x128xf32, #tpu.memory_space<vmem>>, vector<8x128xf32>,
    } else {
    }
    %c0_i32_19 = arith.constant 0 : i32
    %50 = arith.cmpi eq, %arg1, %c0_i32_19 : i32
    %51 = arith.extui %50 : i1 to i32
    %c0_i32_20 = arith.constant 0 : i32
    %52 = arith.cmpi ne, %51, %c0_i32_20 : i32
    scf.if %52 {
      %c0_21 = arith.constant 0 : index
      %c0_22 = arith.constant 0 : index
      %53 = vector.load %arg5[%c0_21, %c0_22] : memref<8x128xf32, #tpu.memory_space<vmem>>, vector<8x128xf32>
      %c0_23 = arith.constant 0 : index
      %c0_24 = arith.constant 0 : index
      %54 = vector.load %arg4[%c0_23, %c0_24] : memref<8x128xf32, #tpu.memory_space<vmem>>, vector<8x128xf32>
      tpu.vector_store %arg4[%c0_23, %c0_24], %53 {strides = array<i32>} : memref<8x128xf32, #tpu.memory_space<vmem>>, vector<8x128xf32>,
    } else {
    }
    return
  }
  func.func @transform_0(%arg0: i32, %arg1: i32) -> (i32, i32) {
    %c1_i32 = arith.constant 1 : i32
    %0 = arith.muli %arg0, %c1_i32 : i32
    %1 = arith.addi %0, %arg1 : i32
    %c0_i32 = arith.constant 0 : i32
    %2 = arith.minsi %1, %c0_i32 : i32
    %c0_i32_0 = arith.constant 0 : i32
    %c0_i32_1 = arith.constant 0 : i32
    return %2, %c0_i32_0 : i32, i32
  }
  func.func @transform_1(%arg0: i32, %arg1: i32) -> (i32, i32) {
    %c1_i32 = arith.constant 1 : i32
    %0 = arith.muli %arg0, %c1_i32 : i32
    %1 = arith.addi %0, %arg1 : i32
    %c0_i32 = arith.constant 0 : i32
    %2 = arith.minsi %1, %c0_i32 : i32
    %c0_i32_0 = arith.constant 0 : i32
    %c0_i32_1 = arith.constant 0 : i32
    return %2, %c0_i32_0 : i32, i32
  }
  func.func @transform_2(%arg0: i32, %arg1: i32) -> (i32, i32) {
    %c0_i32 = arith.constant 0 : i32
    %c0_i32_0 = arith.constant 0 : i32
    return %arg0, %c0_i32 : i32, i32
  }
}

</mosaic_0001>

<bundles_post_ra>
// kernel: tpu_custom_call.1
= control target key start
LH: loop header
LB: loop body
LE: loop exit
PB: predicated region body
PF: predicated region fallthrough
CT: control target
= control target key end

     0   :  { %7 = vsyncpa [#allocation4], 0  ;;  %s317_s0 = inlined_call_operand.hbm [shape: f32[16,128], index: 0, kind: input, shape index: {}]   ;;  %s318_s1 = inlined_call_operand.hbm [shape: f32[16,128], index: 1, kind: input, shape index: {}]   ;;  %s319_s2 = inlined_call_operand.hbm [shape: f32[8,128], index: 2, kind: output, shape index: {}]  }
   0x1   :  { %8 = vsyncpa [#allocation7], 0 }
   0x2   :  { %9 = vsyncpa [#allocation5], 0  ;;  %s288_s9 = smov [#allocation3]  }
   0x3   :  { %s21_s10 = sshll.u32 %s288_s9, 4  ;;  %s22_s10 = int_to_ptr.vmem [resolvable:$true] %s21_s10 }
   0x4   :  { %s230_s11 = scalar_lea.vmem %s22_s10, 256  ;;  %p235_p1 = scmp.lt.s32.totalorder %s22_s10, %s22_s10 }
   0x5   :  { %p231_p0 = scmp.ne.s32.totalorder %s22_s10, %s230_s11  ;;  %p236_p2 = scmp.lt.s32.totalorder %s230_s11, %s230_s11 }
   0x7   :  { %p237_p3 = por %p236_p2, %p235_p1 }
   0x9   :  { %p238_p4 = pnand %p237_p3, %p231_p0 }
   0xb   :  { %241 = shalt.err (!%p238_p4)
}
   0xc   :  { %s289_s12 = smov 128   ;;  %s290_s13 = smov 8  }
   0xd   :  { %27 = dma.hbm_to_vmem [thread:$0]  %s317_s0, 256, %s22_s10, [#allocation4], %s289_s12, %s289_s12, %s290_s13  }
   0xe   :  { %s291_s16 = smov [#allocation6]  }
   0xf   :  { %s39_s17 = sshll.u32 %s291_s16, 4  ;;  %s40_s17 = int_to_ptr.vmem [resolvable:$true] %s39_s17 }
  0x10   :  { %s250_s18 = scalar_lea.vmem %s40_s17, 256  ;;  %p255_p6 = scmp.lt.s32.totalorder %s40_s17, %s40_s17 }
  0x11   :  { %p251_p5 = scmp.ne.s32.totalorder %s40_s17, %s250_s18  ;;  %p256_p7 = scmp.lt.s32.totalorder %s250_s18, %s250_s18 }
  0x13   :  { %p257_p8 = por %p256_p7, %p255_p6 }
  0x15   :  { %p258_p9 = pnand %p257_p8, %p251_p5 }
  0x17   :  { %261 = shalt.err (!%p258_p9)
}
  0x18   :  { %45 = dma.hbm_to_vmem [thread:$0]  %s318_s1, 256, %s40_s17, [#allocation7], %s289_s12, %s289_s12, %s290_s13  }
  0x19   :  { %282 = dma.done.wait [#allocation4], 256  }
  0x1a   :  { %283 = vsyncadd [#allocation4], 4294967040 }
  0x1b   :  { %284 = dma.done.wait [#allocation7], 256  }
  0x1c   :  { %285 = vsyncadd [#allocation7], 4294967040  ;;  %v65_v0 = vld [vmem:[#allocation3] sm:$0xff]  ;;  %v66_v1 = vld [vmem:[#allocation3 + $0x8] sm:$0xff]  ;;  %s292_s0 = smov [#allocation8]  }
  0x1d   :  { %v69_v2 = vand.u32 2147483647, %v65_v0  ;;  %v70_v3 = vand.u32 2147483647, %v66_v1  ;;  %v67_v12 = vld [vmem:[#allocation6] sm:$0xff]  ;;  %v68_v13 = vld [vmem:[#allocation6 + $0x8] sm:$0xff] }
  0x1e   :  { %vm103_vm0 = vcmp.ge.f32.partialorder %v65_v0, 0.0  ;;  %v117_v14 = vmul.f32 2.0, %v67_v12  ;;  %vm104_vm1 = vcmp.ge.f32.partialorder %v66_v1, 0.0  ;;  %v118_v15 = vmul.f32 2.0, %v68_v13  ;;  %s187_s1 = sshll.u32 %s292_s0, 4  ;;  %s188_s1 = int_to_ptr.vmem [resolvable:$true] %s187_s1 }
  0x1f   :  { %v71_v4 = vsub.f32 0.0, %v69_v2  ;;  %v72_v5 = vsub.f32 0.0, %v70_v3  ;;  %v77_v38 = vmax.f32 %v65_v0, 0.0  ;;  %v79_v39 = vmul.f32 %v67_v12, %v65_v0  ;;  %s262_s21 = scalar_lea.vmem %s188_s1, 128  ;;  %p267_p11 = scmp.lt.s32.totalorder %s188_s1, %s188_s1 }
  0x20   :  { %v119_v18 = vsub.f32 1.0, %v117_v14  ;;  %v120_v20 = vsub.f32 1.0, %v118_v15  ;;  %v78_v40 = vmax.f32 %v66_v1, 0.0  ;;  %v80_v41 = vmul.f32 %v68_v13, %v66_v1  ;;  %p263_p10 = scmp.ne.s32.totalorder %s188_s1, %s262_s21  ;;  %p268_p12 = scmp.lt.s32.totalorder %s262_s21, %s262_s21 }
  0x21   :  { %v73_v6 = vmul.f32 1.442695, %v71_v4  ;;  %v75_v7 = vmul.f32 1.442695, %v72_v5  ;;  %v81_v46 = vsub.f32 %v77_v38, %v79_v39  ;;  %v113_v47 = vmul.f32 -0.5, %v67_v12 }
  0x22   :  { %v82_v48 = vsub.f32 %v78_v40, %v80_v41  ;;  %v114_v50 = vmul.f32 -0.5, %v68_v13  ;;  %p269_p13 = por %p268_p12, %p267_p11 }
  0x23   :  { %206 = vpow2.f32 %v73_v6  ;;  %v115_v53 = vadd.f32 0.75, %v113_v47 }
  0x24   :  { %208 = vpow2.f32 %v75_v7  ;;  %v116_v56 = vadd.f32 0.75, %v114_v50  ;;  %p270_p0 = pnand %p269_p13, %p263_p10 }
  0x30   :  { %v207_v8 = vpop.eup %206 }
  0x31   :  { %v209_v9 = vpop.eup %208  ;;  %v83_v10 = vadd.f32 1.0, %v207_v8  ;;  %v105_v16 = vsel %vm103_vm0, 1.0, %v207_v8  ;;  %v86_v27 = vmul.f32 -0.5, %v207_v8  ;;  %v89_v34 = vand.u32 2147483647, %v207_v8 }
  0x32   :  { %v92_v11 = vadd.f32 1.0, %v209_v9  ;;  %v106_v17 = vsel %vm104_vm1, 1.0, %v209_v9  ;;  %v95_v29 = vmul.f32 -0.5, %v209_v9  ;;  %v98_v37 = vand.u32 2147483647, %v209_v9 }
  0x33   :  { %210 = vrcp.f32 %v83_v10  ;;  %v87_v32 = vadd.f32 1.0, %v86_v27  ;;  %vm90_vm2 = vcmp.lt.f32.partialorder %v89_v34, 0.0004427343 }
  0x34   :  { %212 = vrcp.f32 %v92_v11  ;;  %v96_v35 = vadd.f32 1.0, %v95_v29  ;;  %vm99_vm3 = vcmp.lt.f32.partialorder %v98_v37, 0.0004427343 }
  0x35   :  { %214 = vlog2.f32 %v83_v10  ;;  %v88_v43 = vmul.f32 %v207_v8, %v87_v32 }
  0x36   :  { %216 = vlog2.f32 %v92_v11  ;;  %v97_v45 = vmul.f32 %v209_v9, %v96_v35 }
  0x40   :  { %v211_v19 = vpop.eup %210 }
  0x41   :  { %v213_v21 = vpop.eup %212  ;;  %v111_v22 = vmul.f32 %v211_v19, %v105_v16 }
  0x42   :  { %v112_v23 = vmul.f32 %v213_v21, %v106_v17  ;;  %v215_v33 = vpop.eup %214 }
  0x43   :  { %v121_v24 = vmul.f32 %v119_v18, %v111_v22  ;;  %v217_v36 = vpop.eup %216  ;;  %v85_v42 = vmul.f32 0.6931472, %v215_v33 }
  0x44   :  { %v122_v25 = vmul.f32 %v120_v20, %v112_v23  ;;  %v94_v44 = vmul.f32 0.6931472, %v217_v36 }
  0x45   :  { %v123_v26 = vadd.f32 %v121_v24, %v67_v12  ;;  %v91_v49 = vsel %vm90_vm2, %v88_v43, %v85_v42 }
  0x46   :  { %v124_v28 = vadd.f32 %v122_v25, %v68_v13  ;;  %v100_v51 = vsel %vm99_vm3, %v97_v45, %v94_v44  ;;  %v101_v52 = vadd.f32 %v91_v49, %v81_v46 }
  0x47   :  { %v125_v30 = vmax.f32 %v123_v26, 0.0  ;;  %v102_v55 = vadd.f32 %v100_v51, %v82_v48 }
  0x48   :  { %v126_v31 = vmax.f32 %v124_v28, 0.0  ;;  %v143_v63 = vmul.f32 %v115_v53, %v101_v52 }
  0x49   :  { %218 = vrsqrt.f32 %v125_v30  ;;  %vm129_vm4 = vcmp.eq.f32.partialorder %v125_v30, inf  ;;  %v132_v57 = vand.u32 2147483648, %v125_v30  ;;  %vm131_vm5 = vcmp.eq.f32.partialorder %v125_v30, 0.0 }
  0x4a   :  { %220 = vrsqrt.f32 %v126_v31  ;;  %vm136_vm6 = vcmp.eq.f32.partialorder %v126_v31, inf  ;;  %v139_v60 = vand.u32 2147483648, %v126_v31  ;;  %vm138_vm7 = vcmp.eq.f32.partialorder %v126_v31, 0.0 }
  0x4b   :  { %v144_v2 = vmul.f32 %v116_v56, %v102_v55 }
  0x56   :  { %v219_v54 = vpop.eup %218 }
  0x57   :  { %v221_v58 = vpop.eup %220  ;;  %v128_v59 = vmul.f32 %v219_v54, %v125_v30 }
  0x58   :  { %v135_v61 = vmul.f32 %v221_v58, %v126_v31 }
  0x59   :  { %v130_v62 = vsel %vm129_vm4, %v125_v30, %v128_v59 }
  0x5a   :  { %v133_v0 = vsel %vm131_vm5, %v132_v57, %v130_v62  ;;  %v137_v1 = vsel %vm136_vm6, %v126_v31, %v135_v61 }
  0x5b   :  { %v140_v3 = vsel %vm138_vm7, %v139_v60, %v137_v1  ;;  %v141_v4 = vmul.f32 %v133_v0, %v125_v30 }
  0x5c   :  { %v142_v5 = vmul.f32 %v140_v3, %v126_v31 }
  0x5d   :  { %v145_v6 = vmul.f32 %v143_v63, %v141_v4 }
  0x5e   :  { %v146_v7 = vmul.f32 %v144_v2, %v142_v5 }
  0x60   :  { %v155_v8 = vadd.f32 %v146_v7, %v145_v6 }
  0x62   :  { %180 = vst [vmem:[#allocation8] sm:$0xff] %v155_v8 }
  0x63   :  { %273 = shalt.err (!%p270_p0)
}
  0x64   :  { %190 = dma.vmem_to_hbm [thread:$0]  %s188_s1, 128, %s319_s2, [#allocation5]  }
  0x65   :  { %286 = dma.done.wait [#allocation5], 128  }
  0x66   :  { %287 = vsyncadd [#allocation5], 4294967168 }
  0x67   :  { %194 = vsyncpa [#allocation4], 1 }
  0x68   :  { %195 = vsyncpa [#allocation7], 1 }
  0x69   :  { %196 = vsyncpa [#allocation5], 1 }

</bundles_post_ra>
